<compile_context>
chip_gen: v5e
topology: v5e:2x2
jax: 0.10.0
libtpu: 0.0.40
codegen_flags: <defaults>
</compile_context>

<pallas_src>
import jax
import jax.numpy as jnp
from jax import lax
from jax.experimental import pallas as pl
from jax.experimental.pallas import tpu as pltpu

EPS = 1e-5          # nn.InstanceNorm1d default eps
NEG_SLOPE = 0.2     # LeakyReLU(0.2)
_F32 = 4            # bytes per float32


# ----------------------------------------------------------------------------- helpers
def _round_up(x, m):
    return (x + m - 1) // m * m


def _divisors(n):
    out, d = [], 1
    while d * d <= n:
        if n % d == 0:
            out.append(d)
            if d != n // d:
                out.append(n // d)
        d += 1
    return out


def _vmem_budget_bytes():
    """Generation-aware VMEM request: leave headroom below physical capacity."""
    try:
        cap = int(pltpu.get_tpu_info().vmem_capacity_bytes)
    except Exception:
        cap = 64 << 20                      # conservative default (v7x per-TC VMEM)
    if cap <= (64 << 20):                   # v7x-class (64 MiB physical)
        budget = min(cap - (16 << 20), 48 << 20)
    else:                                   # v5e / v6e (128 MiB physical)
        budget = min(cap - (28 << 20), 100 << 20)
    return max(budget, 16 << 20)


def _single_pass_vmem_need(chans, n, bt, w_bytes):
    c0, c_last, c_max = chans[0], chans[-1], max(chans)
    io = 2 * bt * (c0 + c_last) * n * _F32          # double-buffered in/out blocks
    temps = 4 * bt * c_max * n * _F32               # y, centered, normalized, activated
    return io + 2 * w_bytes + temps + (2 << 20)     # + compiler headroom


def _multi_pass_vmem_need(chans, n_tile, w_bytes):
    c0, c_last, c_max = chans[0], chans[-1], max(chans)
    c_scr = _round_up(max(chans[1:]), 8)
    io = 2 * (c0 + c_last) * n_tile * _F32          # double-buffered in/out blocks
    scr = c_scr * n_tile * _F32                     # gated pre-activation scratch
    temps = 3 * c_max * n_tile * _F32               # normalize / LeakyReLU temps
    stats = 4 * sum(chans[1:]) * 128 * _F32         # (c,1) stat refs pad lanes to 128
    return io + scr + temps + stats + 2 * w_bytes + (2 << 20)


def _choose_n_tile(n, fits):
    """Largest lane-dense (multiple-of-128) divisor of n that fits the VMEM budget."""
    for t in sorted((d for d in _divisors(n) if d % 128 == 0), reverse=True):
        if fits(t):
            return t
    if fits(n):     # full-dim block is always layout-legal even if not 128-aligned
        return n
    # TODO(synk): support huge non-128-aligned N via padding + lane-masked stats.
    raise ValueError(f"No VMEM-feasible N tile for N={n}; pad N to a multiple of 128.")


def _instance_norm_leaky_relu(y, axis):
    """InstanceNorm1d (biased, centered variance, eps=1e-5, affine=False) + LeakyReLU."""
    mean = jnp.mean(y, axis=axis, keepdims=True)
    cen = y - mean
    var = jnp.mean(cen * cen, axis=axis, keepdims=True)
    y_n = cen * lax.rsqrt(var + EPS)                               # EUP rsqrt
    return jnp.where(y_n >= 0.0, y_n, NEG_SLOPE * y_n)


# ----------------------------------------------------------------------- kernel bodies
def _make_single_pass_kernel(chans, bt):
    """One grid step = bt batch elements, full N; every layer computed exactly once."""
    num_layers = len(chans) - 1

    def kernel(x_ref, *refs):
        w_refs = refs[:num_layers]
        o_ref = refs[num_layers]

        if bt == 1:
            a = x_ref[0].astype(jnp.float32)                       # (C0, N)
            for l in range(num_layers):
                # 1x1 conv in NCL layout == plain matmul on the MXU: y = W @ a.
                y = jnp.dot(w_refs[l][...], a,
                            preferred_element_type=jnp.float32)    # (C_{l+1}, N)
                a = _instance_norm_leaky_relu(y, axis=1)
            o_ref[0] = a.astype(o_ref.dtype)
        else:
            a = x_ref[...].astype(jnp.float32)                     # (bt, C0, N)
            for l in range(num_layers):
                w = w_refs[l][...]
                co, ci = w.shape
                wb = jnp.broadcast_to(w[None], (bt, co, ci))       # tiny, per-layer
                y = jnp.einsum("boc,bcn->bon", wb, a,
                               preferred_element_type=jnp.float32)  # (bt, C_{l+1}, N)
                a = _instance_norm_leaky_relu(y, axis=2)
            o_ref[...] = a.astype(o_ref.dtype)

    return kernel


def _make_multi_pass_kernel(chans, n_total, n_tiles, n_tile):
    """Fallback for huge N: pass l accumulates layer-l stats; the final pass writes.

    Layer l's matmul only runs on passes p >= l (gated), and scale/shift are
    finalized once per (batch, layer) at the last tile of pass l.
    NOTE: stats use E[y^2]-E[y]^2 with a clamp; fine for normalized activations.
    """
    num_layers = len(chans) - 1
    inv_n = 1.0 / float(n_total)
    c_scr = _round_up(max(chans[1:]), 8)

    def kernel(x_ref, *refs):
        w_refs = refs[:num_layers]
        o_ref = refs[num_layers]
        scratch = refs[num_layers + 1:]
        sum_refs = scratch[0:num_layers]
        ssq_refs = scratch[num_layers:2 * num_layers]
        scale_refs = scratch[2 * num_layers:3 * num_layers]
        shift_refs = scratch[3 * num_layers:4 * num_layers]
        y_scr = scratch[4 * num_layers]                            # (c_scr, n_tile)

        p = pl.program_id(1)        # pass index: 0 .. num_layers
        n_idx = pl.program_id(2)    # N-tile index

        # New batch element: reset the per-layer accumulators.
        @pl.when((p == 0) & (n_idx == 0))
        def _reset():
            for l in range(num_layers):
                sum_refs[l][...] = jnp.zeros_like(sum_refs[l])
                ssq_refs[l][...] = jnp.zeros_like(ssq_refs[l])

        a = x_ref[0].astype(jnp.float32)                           # (C0, n_tile)
        for l in range(num_layers):
            co = chans[l + 1]
            if l == 0:
                # Every pass needs layer 0.
                y = jnp.dot(w_refs[0][...], a, preferred_element_type=jnp.float32)
            else:
                # Only passes p >= l need layer l; skip its MXU work otherwise.
                @pl.when(p >= l)
                def _mm(a=a, l=l, co=co):
                    y_scr[:co, :] = jnp.dot(w_refs[l][...], a,
                                            preferred_element_type=jnp.float32)
                y = y_scr[:co, :]   # stale when p < l; never consumed (all uses gated)

            @pl.when(p == l)
            def _accum(y=y, l=l):
                sum_refs[l][...] += jnp.sum(y, axis=1, keepdims=True)
                ssq_refs[l][...] += jnp.sum(y * y, axis=1, keepdims=True)

            # Finalize per-(batch, layer) scale/shift once, at the last tile of pass l.
            @pl.when((p == l) & (n_idx == n_tiles - 1))
            def _finalize(l=l):
                mean = sum_refs[l][...] * inv_n
                var = jnp.maximum(ssq_refs[l][...] * inv_n - mean * mean, 0.0)
                sc = lax.rsqrt(var + EPS)
                scale_refs[l][...] = sc
                shift_refs[l][...] = -mean * sc

            # Affine normalize + LeakyReLU.  Valid whenever p > l (stats complete);
            # garbage otherwise, but such `a` only feeds gated consumers.
            y_n = y * scale_refs[l][...] + shift_refs[l][...]
            a = jnp.where(y_n >= 0.0, y_n, NEG_SLOPE * y_n)

        @pl.when(p == num_layers)
        def _write(a=a):
            o_ref[0] = a.astype(o_ref.dtype)

    return kernel


# ------------------------------------------------------------------------------ wrapper
def shared_mlp1d(x_ncl, weights, *, force_multi_pass=False):
    """Forward pass matching SharedMLP1d(channels, norm='instance').

    x_ncl  : (B, C0, N) float32, PyTorch NCL layout (kept end-to-end).
    weights: list of (C_i, C_{i-1}) float32 Conv1d(kernel_size=1, bias=False) weights.
    returns: (B, C_K, N) float32 in NCL layout.
    """
    B, c0, N = (int(d) for d in x_ncl.shape)
    num_layers = len(weights)
    chans = [c0] + [int(w.shape[0]) for w in weights]
    c_last = chans[-1]
    w_bytes = sum(int(w.size) for w in weights) * _F32
    budget = _vmem_budget_bytes()
    useful_flops = 2 * B * N * sum(chans[i] * chans[i + 1] for i in range(num_layers))

    # ---------------------------------------------------------------- single-pass path
    if not force_multi_pass and _single_pass_vmem_need(chans, N, 1, w_bytes) <= budget:
        bt = 1
        for cand in range(B, 0, -1):        # fold batch to amortize grid-step overhead
            if B % cand == 0 and _single_pass_vmem_need(chans, N, cand, w_bytes) <= budget:
                bt = cand
                break

        kernel = _make_single_pass_kernel(chans, bt)
        in_specs = [pl.BlockSpec((bt, c0, N), lambda b: (b, 0, 0))]
        for w in weights:
            co, ci = (int(d) for d in w.shape)
            in_specs.append(pl.BlockSpec((co, ci), lambda b: (0, 0)))
        out_spec = pl.BlockSpec((bt, c_last, N), lambda b: (b, 0, 0))

        cost = pl.CostEstimate(
            flops=int(useful_flops),
            transcendentals=int(B * sum(chans[1:])),
            bytes_accessed=int(_F32 * B * N * (c0 + c_last) + w_bytes),
        )
        vmem_limit = int(min(budget,
                             max(_single_pass_vmem_need(chans, N, bt, w_bytes) + (4 << 20),
                                 32 << 20)))
        # TODO(synk): on v7x, pltpu.CORE_PARALLEL on the batch axis (or per-core partial
        # stats for B==1) would shard across both TensorCores; "parallel" kept for
        # portability.
        return pl.pallas_call(
            kernel,
            out_shape=jax.ShapeDtypeStruct((B, c_last, N), x_ncl.dtype),
            grid_spec=pltpu.PrefetchScalarGridSpec(
                num_scalar_prefetch=0,
                grid=(B // bt,),
                in_specs=in_specs,
                out_specs=out_spec,
            ),
            compiler_params=pltpu.CompilerParams(
                dimension_semantics=("parallel",),
                vmem_limit_bytes=vmem_limit,
            ),
            cost_estimate=cost,
        )(x_ncl, *weights)

    # ------------------------------------------------------------- multi-pass fallback
    n_tile = _choose_n_tile(N, lambda t: _multi_pass_vmem_need(chans, t, w_bytes) <= budget)
    n_tiles = N // n_tile
    last_pass = num_layers
    c_scr = _round_up(max(chans[1:]), 8)

    kernel = _make_multi_pass_kernel(chans, N, n_tiles, n_tile)

    in_specs = [pl.BlockSpec((1, c0, n_tile), lambda b, p, n: (b, 0, n))]
    for w in weights:
        co, ci = (int(d) for d in w.shape)
        in_specs.append(pl.BlockSpec((co, ci), lambda b, p, n: (0, 0)))

    # The output block index only advances on the final pass, so Pallas never flushes an
    # unwritten resident buffer to HBM during the stat-accumulation passes.  Relies on
    # the "flush only when the output block index changes" revisiting semantics.
    out_spec = pl.BlockSpec(
        (1, c_last, n_tile),
        lambda b, p, n: (b, 0, jnp.where(p == last_pass, n, 0)),
    )

    scratch_shapes = (
        [pltpu.VMEM((c, 1), jnp.float32) for c in chans[1:]]      # sum
        + [pltpu.VMEM((c, 1), jnp.float32) for c in chans[1:]]    # sum of squares
        + [pltpu.VMEM((c, 1), jnp.float32) for c in chans[1:]]    # scale = rsqrt(var+eps)
        + [pltpu.VMEM((c, 1), jnp.float32) for c in chans[1:]]    # shift = -mean*scale
        + [pltpu.VMEM((c_scr, n_tile), jnp.float32)]              # gated pre-activation
    )

    # Pass p recomputes layers 0..p, so layer l runs (K + 1 - l) times.
    recompute_flops = 2 * B * N * sum(
        (num_layers + 1 - l) * chans[l] * chans[l + 1] for l in range(num_layers))
    cost = pl.CostEstimate(
        flops=int(recompute_flops),
        transcendentals=int(B * sum(chans[1:])),
        bytes_accessed=int(_F32 * (B * N * c0 * (num_layers + 1) + B * N * c_last)
                           + w_bytes),
    )
    vmem_limit = int(min(budget,
                         max(_multi_pass_vmem_need(chans, n_tile, w_bytes) + (4 << 20),
                             32 << 20)))

    return pl.pallas_call(
        kernel,
        out_shape=jax.ShapeDtypeStruct((B, c_last, N), x_ncl.dtype),
        grid_spec=pltpu.PrefetchScalarGridSpec(
            num_scalar_prefetch=0,
            grid=(B, num_layers + 1, n_tiles),
            in_specs=in_specs,
            out_specs=out_spec,
            scratch_shapes=scratch_shapes,
        ),
        compiler_params=pltpu.CompilerParams(
            dimension_semantics=("parallel", "arbitrary", "arbitrary"),
            vmem_limit_bytes=vmem_limit,
        ),
        cost_estimate=cost,
    )(x_ncl, *weights)


# --------------------------------------------------------------------- params/reference
def init_shared_mlp1d_params(key, channels):
    """Deterministic Conv1d(kernel_size=1, bias=False) weights: (Cout, Cin) each."""
    weights = []
    for i in range(1, len(channels)):
        key, sub = jax.random.split(key)
        fan_in = channels[i - 1]
        w = jax.random.normal(sub, (channels[i], channels[i - 1]),
                              dtype=jnp.float32) * (1.0 / jnp.sqrt(fan_in))
        weights.append(w)
    return weights


def _reference(x_ncl, weights):
    """Pure-JAX reference (high-precision matmuls) for the correctness check."""
    x = x_ncl
    for w in weights:
        y = jnp.einsum("oc,bcn->bon", w, x, precision=lax.Precision.HIGHEST)  # 1x1 conv
        mean = jnp.mean(y, axis=2, keepdims=True)                             # per (b, c)
        var = jnp.mean((y - mean) ** 2, axis=2, keepdims=True)
        y = (y - mean) / jnp.sqrt(var + EPS)
        x = jnp.where(y >= 0, y, NEG_SLOPE * y)
    return x


if __name__ == "__main__":
    # SharedMLP1d(channels=[4, 32, 64], norm='instance')
    channels = [4, 32, 64]
    B, N = 2, 16

    key = jax.random.PRNGKey(0)
    key_x, key_w, key_x2 = jax.random.split(key, 3)
    x = jax.random.normal(key_x, (B, channels[0], N), dtype=jnp.float32)
    weights = init_shared_mlp1d_params(key_w, channels)

    # Primary (single-pass fused) path.
    out = jax.block_until_ready(shared_mlp1d(x, weights))
    ref = _reference(x, weights)
    assert out.shape == (B, channels[-1], N)
    # Tolerance covers MXU default-precision matmul paths; structural errors are O(1).
    assert jnp.allclose(out, ref, atol=2e-2, rtol=2e-2), \
        float(jnp.max(jnp.abs(out - ref)))

    # Multi-pass fallback (huge-N path), forced at a small 128-aligned N.
    x2 = jax.random.normal(key_x2, (B, channels[0], 512), dtype=jnp.float32)
    out2 = jax.block_until_ready(shared_mlp1d(x2, weights, force_multi_pass=True))
    ref2 = _reference(x2, weights)
    assert out2.shape == (B, channels[-1], 512)
    assert jnp.allclose(out2, ref2, atol=2e-2, rtol=2e-2), \
        float(jnp.max(jnp.abs(out2 - ref2)))

    print("KERNEL_OK")
</pallas_src>

<mosaic_0001>
module attributes {stable_mosaic.version = 11 : i64} {
  func.func @kernel(%arg0: i32, %arg1: memref<2x4x16xf32, #tpu.memory_space<vmem>>, %arg2: memref<32x4xf32, #tpu.memory_space<vmem>>, %arg3: memref<64x32xf32, #tpu.memory_space<vmem>>, %arg4: memref<2x64x16xf32, #tpu.memory_space<vmem>>) attributes {dimension_semantics = [#tpu.dimension_semantics<parallel>], iteration_bounds = array<i64: 1>, scalar_prefetch = 0 : i64, scratch_operands = 0 : i64, tpu.core_type = #tpu.core_type<tc>, window_params = [{transform_indices = @transform_0, window_bounds = array<i64: 2, 4, 16>}, {pipeline_mode = #tpu.pipeline_mode<synchronous>, transform_indices = @transform_1, window_bounds = array<i64: 32, 4>}, {pipeline_mode = #tpu.pipeline_mode<synchronous>, transform_indices = @transform_2, window_bounds = array<i64: 64, 32>}, {transform_indices = @transform_3, window_bounds = array<i64: 2, 64, 16>}]} {
    %c0 = arith.constant 0 : index
    %c0_0 = arith.constant 0 : index
    %c0_1 = arith.constant 0 : index
    %0 = vector.load %arg1[%c0, %c0_0, %c0_1] : memref<2x4x16xf32, #tpu.memory_space<vmem>>, vector<2x4x16xf32>
    %c0_2 = arith.constant 0 : index
    %c0_3 = arith.constant 0 : index
    %1 = vector.load %arg2[%c0_2, %c0_3] : memref<32x4xf32, #tpu.memory_space<vmem>>, vector<32x4xf32>
    %2 = vector.shape_cast %1 : vector<32x4xf32> to vector<1x32x4xf32>
    %3 = vector.shape_cast %2 : vector<1x32x4xf32> to vector<1x32x4xf32>
    %4 = vector.broadcast %3 : vector<1x32x4xf32> to vector<2x32x4xf32>
    "tpu.trace_start"() <{level = 10 : i32, message = "boc,bcn->bon"}> : () -> ()
    %cst = arith.constant dense<0.000000e+00> : vector<2x32x16xf32>
    %5 = tpu.matmul %4, %0, %cst {dimension_numbers = #tpu.dot_dimension_numbers<[2], [1], [1], [2], [0, 0, 0, 1, 1, 2], [0], [0]>} : vector<2x32x4xf32>, vector<2x4x16xf32>, vector<2x32x16xf32> -> vector<2x32x16xf32>
    "tpu.trace_stop"() : () -> ()
    %cst_4 = arith.constant dense<0.000000e+00> : vector<2x32xf32>
    %6 = vector.multi_reduction <add>, %5, %cst_4 [2] : vector<2x32x16xf32> to vector<2x32xf32>
    %7 = vector.shape_cast %6 : vector<2x32xf32> to vector<2x32x1xf32>
    %cst_5 = arith.constant 1.600000e+01 : f32
    %8 = vector.broadcast %cst_5 : f32 to vector<2x32x1xf32>
    %9 = arith.divf %7, %8 : vector<2x32x1xf32>
    %10 = vector.broadcast %9 : vector<2x32x1xf32> to vector<2x32x16xf32>
    %11 = arith.subf %5, %10 : vector<2x32x16xf32>
    %12 = arith.mulf %11, %11 : vector<2x32x16xf32>
    %cst_6 = arith.constant dense<0.000000e+00> : vector<2x32xf32>
    %13 = vector.multi_reduction <add>, %12, %cst_6 [2] : vector<2x32x16xf32> to vector<2x32xf32>
    %14 = vector.shape_cast %13 : vector<2x32xf32> to vector<2x32x1xf32>
    %cst_7 = arith.constant 1.600000e+01 : f32
    %15 = vector.broadcast %cst_7 : f32 to vector<2x32x1xf32>
    %16 = arith.divf %14, %15 : vector<2x32x1xf32>
    %cst_8 = arith.constant 9.99999974E-6 : f32
    %17 = vector.broadcast %cst_8 : f32 to vector<2x32x1xf32>
    %18 = arith.addf %16, %17 : vector<2x32x1xf32>
    %19 = math.rsqrt %18 : vector<2x32x1xf32>
    %20 = vector.broadcast %19 : vector<2x32x1xf32> to vector<2x32x16xf32>
    %21 = arith.mulf %11, %20 : vector<2x32x16xf32>
    %cst_9 = arith.constant 0.000000e+00 : f32
    %22 = vector.broadcast %cst_9 : f32 to vector<2x32x16xf32>
    %23 = arith.cmpf oge, %21, %22 : vector<2x32x16xf32>
    %cst_10 = arith.constant 2.000000e-01 : f32
    %24 = vector.broadcast %cst_10 : f32 to vector<2x32x16xf32>
    %25 = arith.mulf %24, %21 : vector<2x32x16xf32>
    %26 = arith.select %23, %21, %25 : vector<2x32x16xi1>, vector<2x32x16xf32>
    %c0_11 = arith.constant 0 : index
    %c0_12 = arith.constant 0 : index
    %27 = vector.load %arg3[%c0_11, %c0_12] : memref<64x32xf32, #tpu.memory_space<vmem>>, vector<64x32xf32>
    %28 = vector.shape_cast %27 : vector<64x32xf32> to vector<1x64x32xf32>
    %29 = vector.shape_cast %28 : vector<1x64x32xf32> to vector<1x64x32xf32>
    %30 = vector.broadcast %29 : vector<1x64x32xf32> to vector<2x64x32xf32>
    "tpu.trace_start"() <{level = 10 : i32, message = "boc,bcn->bon"}> : () -> ()
    %cst_13 = arith.constant dense<0.000000e+00> : vector<2x64x16xf32>
    %31 = tpu.matmul %30, %26, %cst_13 {dimension_numbers = #tpu.dot_dimension_numbers<[2], [1], [1], [2], [0, 0, 0, 1, 1, 2], [0], [0]>} : vector<2x64x32xf32>, vector<2x32x16xf32>, vector<2x64x16xf32> -> vector<2x64x16xf32>
    "tpu.trace_stop"() : () -> ()
    %cst_14 = arith.constant dense<0.000000e+00> : vector<2x64xf32>
    %32 = vector.multi_reduction <add>, %31, %cst_14 [2] : vector<2x64x16xf32> to vector<2x64xf32>
    %33 = vector.shape_cast %32 : vector<2x64xf32> to vector<2x64x1xf32>
    %cst_15 = arith.constant 1.600000e+01 : f32
    %34 = vector.broadcast %cst_15 : f32 to vector<2x64x1xf32>
    %35 = arith.divf %33, %34 : vector<2x64x1xf32>
    %36 = vector.broadcast %35 : vector<2x64x1xf32> to vector<2x64x16xf32>
    %37 = arith.subf %31, %36 : vector<2x64x16xf32>
    %38 = arith.mulf %37, %37 : vector<2x64x16xf32>
    %cst_16 = arith.constant dense<0.000000e+00> : vector<2x64xf32>
    %39 = vector.multi_reduction <add>, %38, %cst_16 [2] : vector<2x64x16xf32> to vector<2x64xf32>
    %40 = vector.shape_cast %39 : vector<2x64xf32> to vector<2x64x1xf32>
    %cst_17 = arith.constant 1.600000e+01 : f32
    %41 = vector.broadcast %cst_17 : f32 to vector<2x64x1xf32>
    %42 = arith.divf %40, %41 : vector<2x64x1xf32>
    %cst_18 = arith.constant 9.99999974E-6 : f32
    %43 = vector.broadcast %cst_18 : f32 to vector<2x64x1xf32>
    %44 = arith.addf %42, %43 : vector<2x64x1xf32>
    %45 = math.rsqrt %44 : vector<2x64x1xf32>
    %46 = vector.broadcast %45 : vector<2x64x1xf32> to vector<2x64x16xf32>
    %47 = arith.mulf %37, %46 : vector<2x64x16xf32>
    %cst_19 = arith.constant 0.000000e+00 : f32
    %48 = vector.broadcast %cst_19 : f32 to vector<2x64x16xf32>
    %49 = arith.cmpf oge, %47, %48 : vector<2x64x16xf32>
    %cst_20 = arith.constant 2.000000e-01 : f32
    %50 = vector.broadcast %cst_20 : f32 to vector<2x64x16xf32>
    %51 = arith.mulf %50, %47 : vector<2x64x16xf32>
    %52 = arith.select %49, %47, %51 : vector<2x64x16xi1>, vector<2x64x16xf32>
    %c0_21 = arith.constant 0 : index
    %c0_22 = arith.constant 0 : index
    %c0_23 = arith.constant 0 : index
    %53 = vector.load %arg4[%c0_21, %c0_22, %c0_23] : memref<2x64x16xf32, #tpu.memory_space<vmem>>, vector<2x64x16xf32>
    tpu.vector_store %arg4[%c0_21, %c0_22, %c0_23], %52 {strides = array<i32>} : memref<2x64x16xf32, #tpu.memory_space<vmem>>, vector<2x64x16xf32>,
    return
  }
  func.func @transform_0(%arg0: i32) -> (i32, i32, i32) {
    %c0_i32 = arith.constant 0 : i32
    %c0_i32_0 = arith.constant 0 : i32
    %c0_i32_1 = arith.constant 0 : i32
    return %arg0, %c0_i32, %c0_i32_0 : i32, i32, i32
  }
  func.func @transform_1(%arg0: i32) -> (i32, i32) {
    %c0_i32 = arith.constant 0 : i32
    %c0_i32_0 = arith.constant 0 : i32
    %c0_i32_1 = arith.constant 0 : i32
    return %c0_i32, %c0_i32_0 : i32, i32
  }
  func.func @transform_2(%arg0: i32) -> (i32, i32) {
    %c0_i32 = arith.constant 0 : i32
    %c0_i32_0 = arith.constant 0 : i32
    %c0_i32_1 = arith.constant 0 : i32
    return %c0_i32, %c0_i32_0 : i32, i32
  }
  func.func @transform_3(%arg0: i32) -> (i32, i32, i32) {
    %c0_i32 = arith.constant 0 : i32
    %c0_i32_0 = arith.constant 0 : i32
    %c0_i32_1 = arith.constant 0 : i32
    return %arg0, %c0_i32, %c0_i32_0 : i32, i32, i32
  }
}

</mosaic_0001>

<bundles_post_ra>
// kernel: tpu_custom_call.1
= control target key start
LH: loop header
LB: loop body
LE: loop exit
PB: predicated region body
PF: predicated region fallthrough
CT: control target
= control target key end

     0   :  { %vm33_vm0 = vcmask 1043456   ;;  %vm20_vm1 = vcmask 31744   ;;  %vm98_vm2 = vcmask 130048   ;;  %v926_v22 = vmov 16.0   ;;  %s1589_s0 = inlined_call_operand.vmem [shape: f32[2,4,16], index: 0, kind: input, shape index: {}]   ;;  %s1590_s1 = inlined_call_operand.vmem [shape: f32[32,4], index: 1, kind: input, shape index: {}]   ;;  %s1591_s2 = inlined_call_operand.vmem [shape: f32[64,32], index: 2, kind: input, shape index: {}]   ;;  %s1592_s3 = inlined_call_operand.vmem [shape: f32[2,64,16], index: 3, kind: output, shape index: {}]  }
   0x1   :  { %v14_v0 = vld [vmem:[%s1589_s0] sm:$0xf]  ;;  %v15_v2 = vld [vmem:[%s1589_s0 + $0x4] sm:$0xf]  ;;  %v17_v3 = vld [vmem:[%s1590_s1 + $0x8] sm:$0xff]  ;;  %876 = vrcp.f32 %v926_v22 }
   0x2   :  { %v16_v1 = vld [vmem:[%s1590_s1] sm:$0xff]  ;;  %841 = vmatpush.msk.msra.mxu0 %vm33_vm0, %v14_v0  ;;  %846 = vmatpush.msk.msra.mxu1 %vm33_vm0, %v15_v2  ;;  %v18_v4 = vld [vmem:[%s1590_s1 + $0x10] sm:$0xff]  ;;  %v19_v5 = vld [vmem:[%s1590_s1 + $0x18] sm:$0xff] }
   0x3   :  { %842 = vmatmul.msk.f32.vlgmr.msra.gmra.mxu0 %vm20_vm1, %v16_v1  ;;  %847 = vmatmul.msk.f32.vlgmr.msra.gmra.mxu1 %vm20_vm1, %v16_v1 }
   0x7   :  { %v877_v23 = vpop.eup %876 }
   0x8   :  { %v124_v24 = vmul.f32 16.0, %v877_v23  ;;  %vm128_vm3 = vweird.f32 %v877_v23 }
   0xa   :  { %v125_v25 = vsub.f32 1.0, %v124_v24 }
   0xb   :  { %843 = vmatmul.msk.f32.gmra.mxu0 %vm20_vm1, %v17_v3  ;;  %848 = vmatmul.msk.f32.gmra.mxu1 %vm20_vm1, %v17_v3 }
   0xc   :  { %v126_v26 = vmul.f32 %v877_v23, %v125_v25 }
   0xe   :  { %v127_v27 = vadd.f32 %v877_v23, %v126_v26 }
  0x10   :  { %v987_v28 = vsel %vm128_vm3, %v877_v23, %v127_v27 }
  0x13   :  { %844 = vmatmul.msk.f32.gmra.mxu0 %vm20_vm1, %v18_v4  ;;  %849 = vmatmul.msk.f32.gmra.mxu1 %vm20_vm1, %v18_v4 }
  0x1b   :  { %845 = vmatmul.msk.f32.gmra.mxu0 %vm20_vm1, %v19_v5  ;;  %850 = vmatmul.msk.f32.gmra.mxu1 %vm20_vm1, %v19_v5 }
  0x80   :  { %v973_v6 = vpop.f32.mrf.mxu0  ;;  %v975_v7 = vpop.f32.mrf.mxu1 }
  0x81   :  { %v111_v20 = vsel %vm98_vm2, %v975_v7, 0.0  ;;  %v99_v21 = vsel %vm98_vm2, %v973_v6, 0.0 }
  0x88   :  { %v57_v8 = vpop.f32.mrf.mxu0  ;;  %v89_v9 = vpop.f32.mrf.mxu1 }
  0x89   :  { %v102_v10 = vsel %vm98_vm2, %v57_v8, 0.0  ;;  %v114_v11 = vsel %vm98_vm2, %v89_v9, 0.0 }
  0x8a   :  { %103 = vadd.xlane.f32.xlu2 %v102_v10 }
  0x90   :  { %v60_v12 = vpop.f32.mrf.mxu0  ;;  %v92_v14 = vpop.f32.mrf.mxu1 }
  0x91   :  { %v105_v13 = vsel %vm98_vm2, %v60_v12, 0.0  ;;  %v117_v15 = vsel %vm98_vm2, %v92_v14, 0.0 }
  0x92   :  { %115 = vadd.xlane.f32.xlu2 %v114_v11  ;;  %106 = vadd.xlane.f32.xlu1 %v105_v13 }
  0x98   :  { %v63_v16 = vpop.f32.mrf.mxu0  ;;  %v95_v18 = vpop.f32.mrf.mxu1 }
  0x99   :  { %v108_v17 = vsel %vm98_vm2, %v63_v16, 0.0  ;;  %v120_v19 = vsel %vm98_vm2, %v95_v18, 0.0 }
  0x9a   :  { %118 = vadd.xlane.f32.xlu1 %v117_v15  ;;  %109 = vadd.xlane.f32.xlu0 %v108_v17 }
  0xa2   :  { %112 = vadd.xlane.f32.xlu1 %v111_v20  ;;  %121 = vadd.xlane.f32.xlu0 %v120_v19 }
  0xaa   :  { %100 = vadd.xlane.f32.xlu0 %v99_v21 }
  0xfd   :  { %v104_v29 = vpop.xlane.xlu2 %103 }
  0xfe   :  { %v131_v30 = vmul.f32 %v987_v28, %v104_v29 }
 0x100   :  { %v990_v31 = vsub.f32 %v57_v8, %v131_v30 }
 0x102   :  { %v147_v32 = vmul.f32 %v990_v31, %v990_v31 }
 0x104   :  { %v157_v33 = vsel %vm98_vm2, %v147_v32, 0.0 }
 0x105   :  { %v116_v34 = vpop.xlane.xlu2 %115  ;;  %v107_v35 = vpop.xlane.xlu1 %106  ;;  %158 = vadd.xlane.f32.xlu0 %v157_v33 }
 0x106   :  { %v132_v36 = vmul.f32 %v987_v28, %v107_v35  ;;  %v135_v37 = vmul.f32 %v987_v28, %v116_v34 }
 0x108   :  { %v997_v38 = vsub.f32 %v60_v12, %v132_v36  ;;  %v1001_v40 = vsub.f32 %v89_v9, %v135_v37 }
 0x10a   :  { %v148_v39 = vmul.f32 %v997_v38, %v997_v38  ;;  %v151_v47 = vmul.f32 %v1001_v40, %v1001_v40 }
 0x10c   :  { %v160_v41 = vsel %vm98_vm2, %v148_v39, 0.0  ;;  %v169_v50 = vsel %vm98_vm2, %v151_v47, 0.0 }
 0x10d   :  { %161 = vadd.xlane.f32.xlu1 %v160_v41  ;;  %v119_v42 = vpop.xlane.xlu1 %118  ;;  %v110_v43 = vpop.xlane.xlu0 %109 }
 0x10e   :  { %v136_v44 = vmul.f32 %v987_v28, %v119_v42  ;;  %v133_v46 = vmul.f32 %v987_v28, %v110_v43 }
 0x110   :  { %v1005_v45 = vsub.f32 %v92_v14, %v136_v44  ;;  %v1012_v49 = vsub.f32 %v63_v16, %v133_v46 }
 0x112   :  { %v152_v48 = vmul.f32 %v1005_v45, %v1005_v45  ;;  %v149_v57 = vmul.f32 %v1012_v49, %v1012_v49 }
 0x114   :  { %v172_v51 = vsel %vm98_vm2, %v152_v48, 0.0  ;;  %v163_v60 = vsel %vm98_vm2, %v149_v57, 0.0 }
 0x115   :  { %170 = vadd.xlane.f32.xlu1 %v169_v50  ;;  %173 = vadd.xlane.f32.xlu2 %v172_v51  ;;  %v113_v52 = vpop.xlane.xlu1 %112  ;;  %v122_v53 = vpop.xlane.xlu0 %121 }
 0x116   :  { %v137_v54 = vmul.f32 %v987_v28, %v122_v53  ;;  %v134_v55 = vmul.f32 %v987_v28, %v113_v52 }
 0x118   :  { %v1018_v56 = vsub.f32 %v95_v18, %v137_v54  ;;  %v1025_v59 = vsub.f32 %v975_v7, %v134_v55 }
 0x11a   :  { %v153_v58 = vmul.f32 %v1018_v56, %v1018_v56  ;;  %v150_v1 = vmul.f32 %v1025_v59, %v1025_v59 }
 0x11c   :  { %v175_v61 = vsel %vm98_vm2, %v153_v58, 0.0  ;;  %v166_v3 = vsel %vm98_vm2, %v150_v1, 0.0 }
 0x11d   :  { %164 = vadd.xlane.f32.xlu2 %v163_v60  ;;  %176 = vadd.xlane.f32.xlu0 %v175_v61  ;;  %v101_v62 = vpop.xlane.xlu0 %100 }
 0x11e   :  { %v130_v63 = vmul.f32 %v987_v28, %v101_v62 }
 0x120   :  { %v1031_v0 = vsub.f32 %v973_v6, %v130_v63  ;;  %v311_v63 = vld [vmem:[%s1591_s2 + $0x28] sm:$0xff] }
 0x122   :  { %v146_v2 = vmul.f32 %v1031_v0, %v1031_v0 }
 0x124   :  { %v154_v4 = vsel %vm98_vm2, %v146_v2, 0.0 }
 0x125   :  { %167 = vadd.xlane.f32.xlu0 %v166_v3  ;;  %155 = vadd.xlane.f32.xlu2 %v154_v4 }
 0x178   :  { %v159_v5 = vpop.xlane.xlu0 %158 }
 0x179   :  { %v179_v7 = vmul.f32 %v159_v5, %v987_v28 }
 0x17b   :  { %v187_v8 = vadd.f32 1e-05, %v179_v7 }
 0x17d   :  { %878 = vrsqrt.f32 %v187_v8  ;;  %vm210_vm5 = vweird.f32 %v187_v8 }
 0x180   :  { %v162_v9 = vpop.xlane.xlu1 %161 }
 0x181   :  { %v180_v6 = vmul.f32 %v162_v9, %v987_v28 }
 0x183   :  { %v188_v10 = vadd.f32 1e-05, %v180_v6  ;;  %v1041_v11 = vpop.eup %878 }
 0x184   :  { %v205_v17 = vmul.f32 %v1041_v11, %v187_v8  ;;  %vm211_vm4 = vweird.f32 %v1041_v11 }
 0x185   :  { %880 = vrsqrt.f32 %v188_v10  ;;  %vm220_vm7 = vweird.f32 %v188_v10  ;;  %vm1084_vm8 = vmor %vm210_vm5, %vm211_vm4 }
 0x186   :  { %v206_v21 = vmul.f32 %v1041_v11, %v205_v17 }
 0x188   :  { %v174_v12 = vpop.xlane.xlu2 %173  ;;  %v171_v13 = vpop.xlane.xlu1 %170  ;;  %v207_v29 = vmul.f32 0.5, %v206_v21 }
 0x189   :  { %v184_v14 = vmul.f32 %v174_v12, %v987_v28  ;;  %v183_v15 = vmul.f32 %v171_v13, %v987_v28 }
 0x18a   :  { %v208_v39 = vsub.f32 1.5, %v207_v29 }
 0x18b   :  { %v1045_v16 = vpop.eup %880  ;;  %v192_v18 = vadd.f32 1e-05, %v184_v14  ;;  %v1048_v19 = vadd.f32 1e-05, %v183_v15 }
 0x18c   :  { %v215_v20 = vmul.f32 %v1045_v16, %v188_v10  ;;  %v209_v55 = vmul.f32 %v1041_v11, %v208_v39  ;;  %vm221_vm6 = vweird.f32 %v1045_v16 }
 0x18d   :  { %882 = vrsqrt.f32 %v192_v18  ;;  %vm1091_vm10 = vmor %vm220_vm7, %vm221_vm6  ;;  %vm260_vm11 = vweird.f32 %v192_v18  ;;  %vm250_vm15 = vweird.f32 %v1048_v19 }
 0x18e   :  { %884 = vrsqrt.f32 %v1048_v19  ;;  %v216_v22 = vmul.f32 %v1045_v16, %v215_v20  ;;  %v213_v5 = vsel %vm1084_vm8, %v1041_v11, %v209_v55 }
 0x18f   :  { %v1111_v13 = vmul.f32 %v213_v5, %v990_v31 }
 0x190   :  { %v165_v23 = vpop.xlane.xlu2 %164  ;;  %v177_v24 = vpop.xlane.xlu0 %176  ;;  %v217_v34 = vmul.f32 0.5, %v216_v22 }
 0x191   :  { %v181_v25 = vmul.f32 %v165_v23, %v987_v28  ;;  %v185_v26 = vmul.f32 %v177_v24, %v987_v28  ;;  %vm283_vm7 = vcmp.ge.f32.partialorder %v1111_v13, 0.0 }
 0x192   :  { %v218_v42 = vsub.f32 1.5, %v217_v34 }
 0x193   :  { %v1056_v27 = vpop.eup %882  ;;  %v1058_v30 = vadd.f32 1e-05, %v181_v25  ;;  %v1060_v32 = vadd.f32 1e-05, %v185_v26  ;;  %v291_v25 = vmul.f32 0.2, %v1111_v13 }
 0x194   :  { %v1062_v33 = vpop.eup %884  ;;  %v255_v35 = vmul.f32 %v1056_v27, %v192_v18  ;;  %v219_v60 = vmul.f32 %v1045_v16, %v218_v42  ;;  %vm261_vm9 = vweird.f32 %v1056_v27 }
 0x195   :  { %v245_v36 = vmul.f32 %v1062_v33, %v1048_v19  ;;  %886 = vrsqrt.f32 %v1058_v30  ;;  %vm1101_vm12 = vmor %vm260_vm11, %vm261_vm9  ;;  %vm251_vm13 = vweird.f32 %v1062_v33  ;;  %vm230_vm3 = vweird.f32 %v1058_v30 }
 0x196   :  { %v256_v37 = vmul.f32 %v1056_v27, %v255_v35  ;;  %888 = vrsqrt.f32 %v1060_v32  ;;  %v223_v8 = vsel %vm1091_vm10, %v1045_v16, %v219_v60  ;;  %vm1119_vm1 = vmor %vm250_vm15, %vm251_vm13  ;;  %vm270_vm4 = vweird.f32 %v1060_v32 }
 0x197   :  { %v246_v41 = vmul.f32 %v1062_v33, %v245_v36  ;;  %v276_v16 = vmul.f32 %v223_v8, %v997_v38 }
 0x198   :  { %v257_v43 = vmul.f32 0.5, %v256_v37  ;;  %v156_v44 = vpop.xlane.xlu2 %155  ;;  %v168_v46 = vpop.xlane.xlu0 %167 }
 0x199   :  { %v247_v47 = vmul.f32 0.5, %v246_v41  ;;  %v178_v48 = vmul.f32 %v156_v44, %v987_v28  ;;  %v182_v50 = vmul.f32 %v168_v46, %v987_v28  ;;  %vm284_vm8 = vcmp.ge.f32.partialorder %v276_v16, 0.0 }
 0x19a   :  { %v258_v51 = vsub.f32 1.5, %v257_v43 }
 0x19b   :  { %v887_v52 = vpop.eup %886  ;;  %v1074_v53 = vadd.f32 1e-05, %v178_v48  ;;  %v1076_v54 = vadd.f32 1e-05, %v182_v50  ;;  %v248_v61 = vsub.f32 1.5, %v247_v47  ;;  %v299_v48 = vsel %vm283_vm7, %v1111_v13, %v291_v25 }
 0x19c   :  { %v889_v57 = vpop.eup %888  ;;  %v225_v58 = vmul.f32 %v887_v52, %v1058_v30  ;;  %v259_v2 = vmul.f32 %v1056_v27, %v258_v51  ;;  %vm231_vm14 = vweird.f32 %v887_v52 }
 0x19d   :  { %v265_v62 = vmul.f32 %v889_v57, %v1060_v32  ;;  %890 = vrsqrt.f32 %v1074_v53  ;;  %v249_v10 = vmul.f32 %v1062_v33, %v248_v61  ;;  %vm271_vm0 = vweird.f32 %v889_v57  ;;  %vm232_vm5 = vmor %vm230_vm3, %vm231_vm14  ;;  %v307_v61 = vld [vmem:[%s1591_s2 + $0x8] sm:$0xff] }
 0x19e   :  { %v226_v1 = vmul.f32 %v887_v52, %v225_v58  ;;  %892 = vrsqrt.f32 %v1076_v54  ;;  %v263_v11 = vsel %vm1101_vm12, %v1056_v27, %v259_v2  ;;  %vm272_vm6 = vmor %vm270_vm4, %vm271_vm0  ;;  %v292_v32 = vmul.f32 0.2, %v276_v16  ;;  %v306_v58 = vld [vmem:[%s1591_s2] sm:$0xff]  ;;  %v313_v2 = vld [vmem:[%s1591_s2 + $0x38] sm:$0xff] }
 0x19f   :  { %v266_v4 = vmul.f32 %v889_v57, %v265_v62  ;;  %v280_v38 = vmul.f32 %v263_v11, %v1005_v45  ;;  %v253_v22 = vsel %vm1119_vm1, %v1062_v33, %v249_v10  ;;  %vm200_vm14 = vweird.f32 %v1074_v53  ;;  %v310_v62 = vld [vmem:[%s1591_s2 + $0x20] sm:$0xff] }
 0x1a0   :  { %v227_v7 = vmul.f32 0.5, %v226_v1  ;;  %v279_v33 = vmul.f32 %v253_v22, %v1001_v40  ;;  %vm240_vm0 = vweird.f32 %v1076_v54  ;;  %v300_v43 = vsel %vm284_vm8, %v276_v16, %v292_v32  ;;  %v312_v1 = vld [vmem:[%s1591_s2 + $0x30] sm:$0xff] }
 0x1a1   :  { %v267_v6 = vmul.f32 0.5, %v266_v4  ;;  %v296_v36 = vmul.f32 0.2, %v280_v38  ;;  %vm288_vm13 = vcmp.ge.f32.partialorder %v280_v38, 0.0 }
 0x1a2   :  { %v228_v12 = vsub.f32 1.5, %v227_v7  ;;  %v295_v40 = vmul.f32 0.2, %v279_v33  ;;  %vm287_vm1 = vcmp.ge.f32.partialorder %v279_v33, 0.0 }
 0x1a3   :  { %v1113_v14 = vpop.eup %890  ;;  %v268_v15 = vsub.f32 1.5, %v267_v6  ;;  %v304_v46 = vsel %vm288_vm13, %v280_v38, %v296_v36 }
 0x1a4   :  { %v1117_v17 = vpop.eup %892  ;;  %v195_v31 = vmul.f32 %v1113_v14, %v1074_v53  ;;  %v229_v20 = vmul.f32 %v887_v52, %v228_v12  ;;  %vm201_vm10 = vweird.f32 %v1113_v14 }
 0x1a5   :  { %v235_v19 = vmul.f32 %v1117_v17, %v1076_v54  ;;  %v269_v21 = vmul.f32 %v889_v57, %v268_v15  ;;  %vm241_vm12 = vweird.f32 %v1117_v17  ;;  %vm202_vm15 = vmor %vm200_vm14, %vm201_vm10 }
 0x1a6   :  { %v196_v23 = vmul.f32 %v1113_v14, %v195_v31  ;;  %v233_v24 = vsel %vm232_vm5, %v887_v52, %v229_v20  ;;  %vm242_vm3 = vmor %vm240_vm0, %vm241_vm12  ;;  %v303_v52 = vsel %vm287_vm1, %v279_v33, %v295_v40 }
 0x1a7   :  { %v236_v26 = vmul.f32 %v1117_v17, %v235_v19  ;;  %v277_v27 = vmul.f32 %v233_v24, %v1012_v49  ;;  %v273_v29 = vsel %vm272_vm6, %v889_v57, %v269_v21  ;;  %vm314_vm6 = vcmask 261120  }
 0x1a8   :  { %v197_v30 = vmul.f32 0.5, %v196_v23  ;;  %v281_v45 = vmul.f32 %v273_v29, %v1018_v56 }
 0x1a9   :  { %v237_v34 = vmul.f32 0.5, %v236_v26  ;;  %vm285_vm9 = vcmp.ge.f32.partialorder %v277_v27, 0.0  ;;  %v293_v35 = vmul.f32 0.2, %v277_v27 }
 0x1aa   :  { %v198_v37 = vsub.f32 1.5, %v197_v30  ;;  %vm289_vm11 = vcmp.ge.f32.partialorder %v281_v45, 0.0  ;;  %v297_v39 = vmul.f32 0.2, %v281_v45 }
 0x1ab   :  { %v238_v41 = vsub.f32 1.5, %v237_v34  ;;  %v301_v49 = vsel %vm285_vm9, %v277_v27, %v293_v35 }
 0x1ac   :  { %351 = vmatpush.msrb.mxu0 %v301_v49  ;;  %867 = vmatpush.msra.mxu2 %v301_v49  ;;  %v305_v56 = vsel %vm289_vm11, %v281_v45, %v297_v39  ;;  %v199_v42 = vmul.f32 %v1113_v14, %v198_v37 }
 0x1ad   :  { %392 = vmatpush.msrb.mxu1 %v305_v56  ;;  %871 = vmatpush.msra.mxu3 %v305_v56  ;;  %v239_v44 = vmul.f32 %v1117_v17, %v238_v41 }
 0x1ae   :  { %352 = vmatpush.msrb.mxu0 %v300_v43  ;;  %868 = vmatpush.msra.mxu2 %v300_v43  ;;  %v203_v47 = vsel %vm202_vm15, %v1113_v14, %v199_v42 }
 0x1af   :  { %393 = vmatpush.msrb.mxu1 %v304_v46  ;;  %872 = vmatpush.msra.mxu3 %v304_v46  ;;  %v274_v50 = vmul.f32 %v203_v47, %v1031_v0  ;;  %v243_v51 = vsel %vm242_vm3, %v1117_v17, %v239_v44  ;;  %v308_v0 = vld [vmem:[%s1591_s2 + $0x10] sm:$0xff] }
 0x1b0   :  { %353 = vmatpush.msrb.mxu0 %v299_v48  ;;  %869 = vmatpush.msra.mxu2 %v299_v48  ;;  %v278_v53 = vmul.f32 %v243_v51, %v1025_v59  ;;  %v309_v59 = vld [vmem:[%s1591_s2 + $0x18] sm:$0xff] }
 0x1b1   :  { %394 = vmatpush.msrb.mxu1 %v303_v52  ;;  %873 = vmatpush.msra.mxu3 %v303_v52  ;;  %vm282_vm4 = vcmp.ge.f32.partialorder %v274_v50, 0.0  ;;  %v290_v54 = vmul.f32 0.2, %v274_v50 }
 0x1b2   :  { %vm286_vm5 = vcmp.ge.f32.partialorder %v278_v53, 0.0  ;;  %v294_v55 = vmul.f32 0.2, %v278_v53 }
 0x1b3   :  { %v298_v57 = vsel %vm282_vm4, %v274_v50, %v290_v54 }
 0x1b4   :  { %354 = vmatpush.msrb.mxu0 %v298_v57  ;;  %870 = vmatpush.msra.mxu2 %v298_v57  ;;  %v302_v60 = vsel %vm286_vm5, %v278_v53, %v294_v55 }
 0x1b5   :  { %395 = vmatpush.msrb.mxu1 %v302_v60  ;;  %874 = vmatpush.msra.mxu3 %v302_v60 }
 0x1b6   :  { %851 = vmatmul.msk.f32.vlgmr.msrb.gmra.mxu0 %vm314_vm6, %v306_v58  ;;  %853 = vmatmul.msk.f32.vlgmr.msra.gmra.mxu2 %vm314_vm6, %v308_v0 }
 0x1b7   :  { %859 = vmatmul.msk.f32.vlgmr.msrb.gmra.mxu1 %vm314_vm6, %v306_v58  ;;  %861 = vmatmul.msk.f32.vlgmr.msra.gmra.mxu3 %vm314_vm6, %v308_v0 }
 0x1be   :  { %854 = vmatmul.msk.f32.gmra.mxu2 %vm314_vm6, %v309_v59  ;;  %852 = vmatmul.msk.f32.gmra.mxu0 %vm314_vm6, %v307_v61 }
 0x1bf   :  { %860 = vmatmul.msk.f32.gmra.mxu1 %vm314_vm6, %v307_v61  ;;  %862 = vmatmul.msk.f32.gmra.mxu3 %vm314_vm6, %v309_v59 }
 0x1c6   :  { %855 = vmatmul.msk.f32.gmra.mxu2 %vm314_vm6, %v310_v62 }
 0x1c7   :  { %863 = vmatmul.msk.f32.gmra.mxu3 %vm314_vm6, %v310_v62 }
 0x1ce   :  { %856 = vmatmul.msk.f32.gmra.mxu2 %vm314_vm6, %v311_v63 }
 0x1cf   :  { %864 = vmatmul.msk.f32.gmra.mxu3 %vm314_vm6, %v311_v63 }
 0x1d6   :  { %857 = vmatmul.msk.f32.gmra.mxu2 %vm314_vm6, %v312_v1 }
 0x1d7   :  { %865 = vmatmul.msk.f32.gmra.mxu3 %vm314_vm6, %v312_v1 }
 0x1de   :  { %858 = vmatmul.msk.f32.gmra.mxu2 %vm314_vm6, %v313_v2 }
 0x1df   :  { %866 = vmatmul.msk.f32.gmra.mxu3 %vm314_vm6, %v313_v2 }
 0x233   :  { %v356_v3 = vpop.f32.mrf.mxu0 }
 0x234   :  { %v397_v4 = vpop.f32.mrf.mxu1  ;;  %v421_v5 = vsel %vm98_vm2, %v356_v3, 0.0 }
 0x235   :  { %422 = vadd.xlane.f32.xlu1 %v421_v5  ;;  %v445_v7 = vsel %vm98_vm2, %v397_v4, 0.0 }
 0x236   :  { %446 = vadd.xlane.f32.xlu0 %v445_v7 }
 0x239   :  { %v362_v8 = vpop.f32.mrf.mxu2 }
 0x23a   :  { %v403_v9 = vpop.f32.mrf.mxu3  ;;  %v427_v12 = vsel %vm98_vm2, %v362_v8, 0.0 }
 0x23b   :  { %v451_v6 = vsel %vm98_vm2, %v403_v9, 0.0  ;;  %v1202_v13 = vpop.f32.mrf.mxu0 }
 0x23c   :  { %452 = vadd.xlane.f32.xlu2 %v451_v6  ;;  %v400_v10 = vpop.f32.mrf.mxu1  ;;  %v424_v15 = vsel %vm98_vm2, %v1202_v13, 0.0 }
 0x23d   :  { %v448_v11 = vsel %vm98_vm2, %v400_v10, 0.0 }
 0x23e   :  { %428 = vadd.xlane.f32.xlu0 %v427_v12  ;;  %449 = vadd.xlane.f32.xlu1 %v448_v11 }
 0x241   :  { %v1204_v14 = vpop.f32.mrf.mxu2 }
 0x242   :  { %v1208_v16 = vpop.f32.mrf.mxu3  ;;  %v430_v18 = vsel %vm98_vm2, %v1204_v14, 0.0 }
 0x243   :  { %v454_v17 = vsel %vm98_vm2, %v1208_v16, 0.0 }
 0x244   :  { %425 = vadd.xlane.f32.xlu2 %v424_v15 }
 0x246   :  { %455 = vadd.xlane.f32.xlu0 %v454_v17  ;;  %431 = vadd.xlane.f32.xlu1 %v430_v18 }
 0x249   :  { %v1214_v31 = vpop.f32.mrf.mxu2 }
 0x24a   :  { %v1216_v20 = vpop.f32.mrf.mxu3  ;;  %v433_v19 = vsel %vm98_vm2, %v1214_v31, 0.0 }
 0x24b   :  { %v457_v21 = vsel %vm98_vm2, %v1216_v20, 0.0 }
 0x24c   :  { %434 = vadd.xlane.f32.xlu2 %v433_v19 }
 0x24e   :  { %458 = vadd.xlane.f32.xlu1 %v457_v21 }
 0x251   :  { %v1222_v38 = vpop.f32.mrf.mxu2 }
 0x252   :  { %v1224_v22 = vpop.f32.mrf.mxu3  ;;  %v436_v23 = vsel %vm98_vm2, %v1222_v38, 0.0 }
 0x253   :  { %v460_v24 = vsel %vm98_vm2, %v1224_v22, 0.0  ;;  %437 = vadd.xlane.f32.xlu0 %v436_v23 }
 0x254   :  { %461 = vadd.xlane.f32.xlu2 %v460_v24 }
 0x259   :  { %v1230_v25 = vpop.f32.mrf.mxu2 }
 0x25a   :  { %v1232_v26 = vpop.f32.mrf.mxu3  ;;  %v439_v27 = vsel %vm98_vm2, %v1230_v25, 0.0 }
 0x25b   :  { %v463_v29 = vsel %vm98_vm2, %v1232_v26, 0.0  ;;  %440 = vadd.xlane.f32.xlu1 %v439_v27 }
 0x25c   :  { %464 = vadd.xlane.f32.xlu0 %v463_v29 }
 0x261   :  { %v1238_v30 = vpop.f32.mrf.mxu2 }
 0x262   :  { %v1240_v45 = vpop.f32.mrf.mxu3  ;;  %v442_v32 = vsel %vm98_vm2, %v1238_v30, 0.0 }
 0x263   :  { %443 = vadd.xlane.f32.xlu2 %v442_v32  ;;  %v466_v33 = vsel %vm98_vm2, %v1240_v45, 0.0 }
 0x264   :  { %467 = vadd.xlane.f32.xlu1 %v466_v33 }
 0x2a8   :  { %v423_v34 = vpop.xlane.xlu1 %422 }
 0x2a9   :  { %v469_v35 = vmul.f32 %v423_v34, %v987_v28  ;;  %v447_v36 = vpop.xlane.xlu0 %446 }
 0x2aa   :  { %v477_v37 = vmul.f32 %v447_v36, %v987_v28 }
 0x2ab   :  { %v1248_v39 = vsub.f32 %v356_v3, %v469_v35 }
 0x2ac   :  { %v1250_v41 = vsub.f32 %v397_v4, %v477_v37 }
 0x2ad   :  { %v501_v49 = vmul.f32 %v1248_v39, %v1248_v39 }
 0x2ae   :  { %v509_v56 = vmul.f32 %v1250_v41, %v1250_v41 }
 0x2af   :  { %v453_v40 = vpop.xlane.xlu2 %452  ;;  %v517_v42 = vsel %vm98_vm2, %v501_v49, 0.0 }
 0x2b0   :  { %v479_v43 = vmul.f32 %v453_v40, %v987_v28  ;;  %518 = vadd.xlane.f32.xlu2 %v517_v42  ;;  %v541_v44 = vsel %vm98_vm2, %v509_v56, 0.0 }
 0x2b1   :  { %v429_v46 = vpop.xlane.xlu0 %428  ;;  %542 = vadd.xlane.f32.xlu1 %v541_v44  ;;  %v450_v47 = vpop.xlane.xlu1 %449 }
 0x2b2   :  { %v1259_v48 = vsub.f32 %v403_v9, %v479_v43  ;;  %v471_v50 = vmul.f32 %v429_v46, %v987_v28  ;;  %v478_v51 = vmul.f32 %v450_v47, %v987_v28 }
 0x2b4   :  { %v1263_v52 = vsub.f32 %v362_v8, %v471_v50  ;;  %v1265_v53 = vsub.f32 %v400_v10, %v478_v51  ;;  %v511_v54 = vmul.f32 %v1259_v48, %v1259_v48 }
 0x2b6   :  { %v547_v55 = vsel %vm98_vm2, %v511_v54, 0.0  ;;  %v503_v57 = vmul.f32 %v1263_v52, %v1263_v52  ;;  %v510_v58 = vmul.f32 %v1265_v53, %v1265_v53 }
 0x2b7   :  { %v426_v0 = vpop.xlane.xlu2 %425  ;;  %548 = vadd.xlane.f32.xlu0 %v547_v55 }
 0x2b8   :  { %v470_v60 = vmul.f32 %v426_v0, %v987_v28  ;;  %v523_v59 = vsel %vm98_vm2, %v503_v57, 0.0  ;;  %v544_v61 = vsel %vm98_vm2, %v510_v58, 0.0 }
 0x2b9   :  { %v456_v62 = vpop.xlane.xlu0 %455  ;;  %524 = vadd.xlane.f32.xlu1 %v523_v59  ;;  %545 = vadd.xlane.f32.xlu2 %v544_v61  ;;  %v432_v63 = vpop.xlane.xlu1 %431 }
 0x2ba   :  { %v1278_v1 = vsub.f32 %v1202_v13, %v470_v60  ;;  %v480_v2 = vmul.f32 %v456_v62, %v987_v28  ;;  %v472_v3 = vmul.f32 %v432_v63, %v987_v28 }
 0x2bc   :  { %v1283_v4 = vsub.f32 %v1208_v16, %v480_v2  ;;  %v1286_v5 = vsub.f32 %v1204_v14, %v472_v3  ;;  %v502_v7 = vmul.f32 %v1278_v1, %v1278_v1 }
 0x2be   :  { %v520_v8 = vsel %vm98_vm2, %v502_v7, 0.0  ;;  %v512_v9 = vmul.f32 %v1283_v4, %v1283_v4  ;;  %v504_v6 = vmul.f32 %v1286_v5, %v1286_v5 }
 0x2bf   :  { %v435_v10 = vpop.xlane.xlu2 %434  ;;  %521 = vadd.xlane.f32.xlu0 %v520_v8 }
 0x2c0   :  { %v473_v12 = vmul.f32 %v435_v10, %v987_v28  ;;  %v550_v11 = vsel %vm98_vm2, %v512_v9, 0.0  ;;  %v526_v13 = vsel %vm98_vm2, %v504_v6, 0.0 }
 0x2c1   :  { %551 = vadd.xlane.f32.xlu1 %v550_v11  ;;  %527 = vadd.xlane.f32.xlu2 %v526_v13  ;;  %v459_v14 = vpop.xlane.xlu1 %458 }
 0x2c2   :  { %v1299_v15 = vsub.f32 %v1214_v31, %v473_v12  ;;  %v481_v16 = vmul.f32 %v459_v14, %v987_v28 }
 0x2c4   :  { %v1303_v17 = vsub.f32 %v1216_v20, %v481_v16  ;;  %v505_v18 = vmul.f32 %v1299_v15, %v1299_v15 }
 0x2c6   :  { %v529_v19 = vsel %vm98_vm2, %v505_v18, 0.0  ;;  %v438_v21 = vpop.xlane.xlu0 %437  ;;  %v513_v23 = vmul.f32 %v1303_v17, %v1303_v17 }
 0x2c7   :  { %530 = vadd.xlane.f32.xlu0 %v529_v19  ;;  %v474_v24 = vmul.f32 %v438_v21, %v987_v28  ;;  %v462_v32 = vpop.xlane.xlu2 %461 }
 0x2c8   :  { %v553_v31 = vsel %vm98_vm2, %v513_v23, 0.0 }
 0x2c9   :  { %v1313_v27 = vsub.f32 %v1222_v38, %v474_v24  ;;  %554 = vadd.xlane.f32.xlu2 %v553_v31 }
 0x2cb   :  { %v506_v20 = vmul.f32 %v1313_v27, %v1313_v27 }
 0x2cd   :  { %v532_v29 = vsel %vm98_vm2, %v506_v20, 0.0 }
 0x2ce   :  { %533 = vadd.xlane.f32.xlu1 %v532_v29  ;;  %v441_v33 = vpop.xlane.xlu1 %440 }
 0x2cf   :  { %v465_v34 = vpop.xlane.xlu0 %464  ;;  %v475_v35 = vmul.f32 %v441_v33, %v987_v28 }
 0x2d0   :  { %v483_v36 = vmul.f32 %v465_v34, %v987_v28 }
 0x2d1   :  { %v1321_v37 = vsub.f32 %v1230_v25, %v475_v35 }
 0x2d2   :  { %v1324_v38 = vsub.f32 %v1232_v26, %v483_v36  ;;  %v482_v26 = vmul.f32 %v462_v32, %v987_v28 }
 0x2d3   :  { %v507_v49 = vmul.f32 %v1321_v37, %v1321_v37 }
 0x2d4   :  { %v515_v56 = vmul.f32 %v1324_v38, %v1324_v38  ;;  %v1346_v55 = vsub.f32 %v1224_v22, %v482_v26 }
 0x2d5   :  { %v535_v40 = vsel %vm98_vm2, %v507_v49, 0.0 }
 0x2d6   :  { %v444_v42 = vpop.xlane.xlu2 %443  ;;  %v559_v43 = vsel %vm98_vm2, %v515_v56, 0.0  ;;  %536 = vadd.xlane.f32.xlu2 %v535_v40 }
 0x2d7   :  { %v476_v44 = vmul.f32 %v444_v42, %v987_v28  ;;  %560 = vadd.xlane.f32.xlu1 %v559_v43  ;;  %v468_v25 = vpop.xlane.xlu1 %467 }
 0x2d8   :  { %v484_v46 = vmul.f32 %v468_v25, %v987_v28 }
 0x2d9   :  { %v1336_v47 = vsub.f32 %v1238_v30, %v476_v44  ;;  %v514_v30 = vmul.f32 %v1346_v55, %v1346_v55 }
 0x2da   :  { %v1339_v50 = vsub.f32 %v1240_v45, %v484_v46 }
 0x2db   :  { %v508_v51 = vmul.f32 %v1336_v47, %v1336_v47  ;;  %v556_v45 = vsel %vm98_vm2, %v514_v30, 0.0 }
 0x2dc   :  { %v516_v54 = vmul.f32 %v1339_v50, %v1339_v50 }
 0x2dd   :  { %v538_v57 = vsel %vm98_vm2, %v508_v51, 0.0 }
 0x2de   :  { %539 = vadd.xlane.f32.xlu0 %v538_v57  ;;  %v562_v58 = vsel %vm98_vm2, %v516_v54, 0.0 }
 0x2df   :  { %563 = vadd.xlane.f32.xlu2 %v562_v58 }
 0x2e6   :  { %557 = vadd.xlane.f32.xlu0 %v556_v45 }
 0x323   :  { %v519_v0 = vpop.xlane.xlu2 %518 }
 0x324   :  { %v565_v60 = vmul.f32 %v519_v0, %v987_v28  ;;  %v543_v59 = vpop.xlane.xlu1 %542 }
 0x325   :  { %v573_v61 = vmul.f32 %v543_v59, %v987_v28 }
 0x326   :  { %v581_v22 = vadd.f32 1e-05, %v565_v60 }
 0x327   :  { %v589_v62 = vadd.f32 1e-05, %v573_v61 }
 0x328   :  { %894 = vrsqrt.f32 %v581_v22  ;;  %vm603_vm9 = vweird.f32 %v581_v22 }
 0x329   :  { %896 = vrsqrt.f32 %v589_v62  ;;  %vm683_vm11 = vweird.f32 %v589_v62 }
 0x32a   :  { %v549_v63 = vpop.xlane.xlu0 %548 }
 0x32b   :  { %v575_v2 = vmul.f32 %v549_v63, %v987_v28 }
 0x32c   :  { %v546_v3 = vpop.xlane.xlu2 %545  ;;  %v525_v7 = vpop.xlane.xlu1 %524 }
 0x32d   :  { %v1356_v8 = vadd.f32 1e-05, %v575_v2  ;;  %v574_v9 = vmul.f32 %v546_v3, %v987_v28  ;;  %v567_v6 = vmul.f32 %v525_v7, %v987_v28 }
 0x32e   :  { %v895_v10 = vpop.eup %894 }
 0x32f   :  { %v897_v12 = vpop.eup %896  ;;  %v598_v11 = vmul.f32 %v895_v10, %v581_v22  ;;  %898 = vrsqrt.f32 %v1356_v8  ;;  %v1361_v14 = vadd.f32 1e-05, %v574_v9  ;;  %v1363_v16 = vadd.f32 1e-05, %v567_v6 }
 0x330   :  { %v678_v13 = vmul.f32 %v897_v12, %v589_v62  ;;  %vm604_vm7 = vweird.f32 %v895_v10  ;;  %vm684_vm8 = vweird.f32 %v897_v12  ;;  %vm703_vm12 = vweird.f32 %v1356_v8 }
 0x331   :  { %v599_v18 = vmul.f32 %v895_v10, %v598_v11  ;;  %900 = vrsqrt.f32 %v1361_v14  ;;  %vm605_vm10 = vmor %vm603_vm9, %vm604_vm7  ;;  %vm693_vm14 = vweird.f32 %v1361_v14  ;;  %vm623_vm0 = vweird.f32 %v1363_v16 }
 0x332   :  { %v679_v19 = vmul.f32 %v897_v12, %v678_v13  ;;  %v522_v21 = vpop.xlane.xlu0 %521  ;;  %902 = vrsqrt.f32 %v1363_v16  ;;  %vm685_vm13 = vmor %vm683_vm11, %vm684_vm8 }
 0x333   :  { %v600_v23 = vmul.f32 0.5, %v599_v18  ;;  %v566_v24 = vmul.f32 %v522_v21, %v987_v28 }
 0x334   :  { %v680_v31 = vmul.f32 0.5, %v679_v19  ;;  %v528_v20 = vpop.xlane.xlu2 %527  ;;  %v552_v29 = vpop.xlane.xlu1 %551 }
 0x335   :  { %v899_v32 = vpop.eup %898  ;;  %v601_v33 = vsub.f32 1.5, %v600_v23  ;;  %v1368_v34 = vadd.f32 1e-05, %v566_v24  ;;  %v568_v35 = vmul.f32 %v528_v20, %v987_v28  ;;  %v576_v36 = vmul.f32 %v552_v29, %v987_v28 }
 0x336   :  { %v681_v49 = vsub.f32 1.5, %v680_v31  ;;  %v698_v56 = vmul.f32 %v899_v32, %v1356_v8  ;;  %vm704_vm15 = vweird.f32 %v899_v32 }
 0x337   :  { %v602_v40 = vmul.f32 %v895_v10, %v601_v33  ;;  %904 = vrsqrt.f32 %v1368_v34  ;;  %v1374_v42 = vadd.f32 1e-05, %v568_v35  ;;  %v1376_v43 = vpop.eup %900  ;;  %v1386_v54 = vadd.f32 1e-05, %v576_v36  ;;  %vm705_vm5 = vmor %vm703_vm12, %vm704_vm15 }
 0x338   :  { %v682_v44 = vmul.f32 %v897_v12, %v681_v49  ;;  %v699_v25 = vmul.f32 %v899_v32, %v698_v56  ;;  %v1380_v46 = vpop.eup %902  ;;  %v688_v51 = vmul.f32 %v1376_v43, %v1361_v14  ;;  %vm613_vm4 = vweird.f32 %v1368_v34 }
 0x339   :  { %v606_v26 = vsel %vm605_vm10, %v895_v10, %v602_v40  ;;  %906 = vrsqrt.f32 %v1374_v42  ;;  %v618_v45 = vmul.f32 %v1380_v46, %v1363_v16  ;;  %vm694_vm6 = vweird.f32 %v1376_v43 }
 0x33a   :  { %v757_v57 = vmul.f32 %v606_v26, %v1248_v39  ;;  %v686_v58 = vsel %vm685_vm13, %v897_v12, %v682_v44  ;;  %v700_v30 = vmul.f32 0.5, %v699_v25  ;;  %v689_v60 = vmul.f32 %v1376_v43, %v688_v51  ;;  %v531_v9 = vpop.xlane.xlu0 %530  ;;  %vm695_vm9 = vmor %vm693_vm14, %vm694_vm6 }
 0x33b   :  { %v765_v0 = vmul.f32 %v686_v58, %v1250_v41  ;;  %v619_v22 = vmul.f32 %v1380_v46, %v618_v45  ;;  %908 = vrsqrt.f32 %v1386_v54  ;;  %vm624_vm7 = vweird.f32 %v1380_v46 }
 0x33c   :  { %vm773_vm1 = vcmp.ge.f32.partialorder %v757_v57, 0.0  ;;  %v789_v59 = vmul.f32 0.2, %v757_v57  ;;  %v701_v61 = vsub.f32 1.5, %v700_v30  ;;  %v690_v63 = vmul.f32 0.5, %v689_v60  ;;  %v555_v24 = vpop.xlane.xlu2 %554  ;;  %vm625_vm12 = vmor %vm623_vm0, %vm624_vm7 }
 0x33d   :  { %v1395_v62 = vpop.eup %904  ;;  %vm781_vm3 = vcmp.ge.f32.partialorder %v765_v0, 0.0  ;;  %v797_v39 = vmul.f32 0.2, %v765_v0  ;;  %v620_v41 = vmul.f32 0.5, %v619_v22  ;;  %v569_v23 = vmul.f32 %v531_v9, %v987_v28 }
 0x33e   :  { %v805_v2 = vsel %vm773_vm1, %v757_v57, %v789_v59  ;;  %v702_v3 = vmul.f32 %v899_v32, %v701_v61  ;;  %v608_v7 = vmul.f32 %v1395_v62, %v1368_v34  ;;  %v691_v12 = vsub.f32 1.5, %v690_v63 }
 0x33f   :  { %v1401_v6 = vpop.eup %906  ;;  %821 = vst.msk [vmem:[%s1592_s3] sm:$0xff] %vm98_vm2, %v805_v2  ;;  %v813_v10 = vsel %vm781_vm3, %v765_v0, %v797_v39  ;;  %v621_v13 = vsub.f32 1.5, %v620_v41  ;;  %vm614_vm8 = vweird.f32 %v1395_v62  ;;  %v1435_v14 = vadd.f32 1e-05, %v569_v23 }
 0x340   :  { %829 = vst.msk [vmem:[%s1592_s3 + $0x40] sm:$0xff] %vm98_vm2, %v813_v10  ;;  %v706_v11 = vsel %vm705_vm5, %v899_v32, %v702_v3  ;;  %v609_v18 = vmul.f32 %v1395_v62, %v608_v7  ;;  %v628_v19 = vmul.f32 %v1401_v6, %v1374_v42  ;;  %v692_v21 = vmul.f32 %v1376_v43, %v691_v12  ;;  %vm615_vm15 = vmor %vm613_vm4, %vm614_vm8 }
 0x341   :  { %v767_v8 = vmul.f32 %v706_v11, %v1259_v48  ;;  %v622_v31 = vmul.f32 %v1380_v46, %v621_v13  ;;  %vm634_vm10 = vweird.f32 %v1401_v6  ;;  %v1428_v32 = vpop.eup %908  ;;  %v534_v35 = vpop.xlane.xlu1 %533  ;;  %v577_v26 = vmul.f32 %v555_v24, %v987_v28 }
 0x342   :  { %v610_v20 = vmul.f32 0.5, %v609_v18  ;;  %v629_v29 = vmul.f32 %v1401_v6, %v628_v19  ;;  %v696_v33 = vsel %vm695_vm9, %v1376_v43, %v692_v21  ;;  %v708_v43 = vmul.f32 %v1428_v32, %v1386_v54 }
 0x343   :  { %vm783_vm11 = vcmp.ge.f32.partialorder %v767_v8, 0.0  ;;  %v799_v48 = vmul.f32 0.2, %v767_v8  ;;  %v766_v36 = vmul.f32 %v696_v33, %v1265_v53  ;;  %v626_v49 = vsel %vm625_vm12, %v1380_v46, %v622_v31 }
 0x344   :  { %v611_v56 = vsub.f32 1.5, %v610_v20  ;;  %v630_v40 = vmul.f32 0.5, %v629_v29  ;;  %v759_v25 = vmul.f32 %v626_v49, %v1263_v52  ;;  %v709_v52 = vmul.f32 %v1428_v32, %v708_v43 }
 0x345   :  { %v815_v44 = vsel %vm783_vm11, %v767_v8, %v799_v48  ;;  %vm782_vm13 = vcmp.ge.f32.partialorder %v766_v36, 0.0  ;;  %v798_v16 = vmul.f32 0.2, %v766_v36  ;;  %910 = vrsqrt.f32 %v1435_v14 }
 0x346   :  { %831 = vst.msk [vmem:[%s1592_s3 + $0x50] sm:$0xff] %vm98_vm2, %v815_v44  ;;  %v612_v53 = vmul.f32 %v1395_v62, %v611_v56  ;;  %v631_v46 = vsub.f32 1.5, %v630_v40  ;;  %vm775_vm14 = vcmp.ge.f32.partialorder %v759_v25, 0.0  ;;  %v791_v51 = vmul.f32 0.2, %v759_v25 }
 0x347   :  { %v814_v57 = vsel %vm782_vm13, %v766_v36, %v798_v16  ;;  %vm633_vm0 = vweird.f32 %v1374_v42  ;;  %v710_v0 = vmul.f32 0.5, %v709_v52  ;;  %v1464_v60 = vadd.f32 1e-05, %v577_v26 }
 0x348   :  { %v616_v58 = vsel %vm615_vm15, %v1395_v62, %v612_v53  ;;  %v632_v30 = vmul.f32 %v1401_v6, %v631_v46  ;;  %830 = vst.msk [vmem:[%s1592_s3 + $0x48] sm:$0xff] %vm98_vm2, %v814_v57  ;;  %v807_v45 = vsel %vm775_vm14, %v759_v25, %v791_v51  ;;  %vm635_vm1 = vmor %vm633_vm0, %vm634_vm10  ;;  %vm714_vm3 = vweird.f32 %v1428_v32 }
 0x349   :  { %v758_v34 = vmul.f32 %v616_v58, %v1278_v1  ;;  %v537_v59 = vpop.xlane.xlu2 %536  ;;  %823 = vst.msk [vmem:[%s1592_s3 + $0x10] sm:$0xff] %vm98_vm2, %v807_v45  ;;  %v570_v61 = vmul.f32 %v534_v35, %v987_v28  ;;  %v711_v39 = vsub.f32 1.5, %v710_v0  ;;  %vm713_vm5 = vweird.f32 %v1386_v54 }
 0x34a   :  { %v636_v42 = vsel %vm635_vm1, %v1401_v6, %v632_v30  ;;  %v571_v1 = vmul.f32 %v537_v59, %v987_v28  ;;  %912 = vrsqrt.f32 %v1464_v60  ;;  %v561_v6 = vpop.xlane.xlu1 %560  ;;  %vm715_vm7 = vmor %vm713_vm5, %vm714_vm3  ;;  %vm643_vm10 = vweird.f32 %v1435_v14 }
 0x34b   :  { %vm774_vm4 = vcmp.ge.f32.partialorder %v758_v34, 0.0  ;;  %v790_v22 = vmul.f32 0.2, %v758_v34  ;;  %v760_v62 = vmul.f32 %v636_v42, %v1286_v5  ;;  %v1477_v63 = vadd.f32 1e-05, %v570_v61  ;;  %v911_v3 = vpop.eup %910 }
 0x34c   :  { %v1479_v2 = vadd.f32 1e-05, %v571_v1  ;;  %v712_v9 = vmul.f32 %v1428_v32, %v711_v39  ;;  %v638_v5 = vmul.f32 %v911_v3, %v1435_v14  ;;  %v579_v13 = vmul.f32 %v561_v6, %v987_v28 }
 0x34d   :  { %v806_v41 = vsel %vm774_vm4, %v758_v34, %v790_v22  ;;  %vm776_vm6 = vcmp.ge.f32.partialorder %v760_v62, 0.0  ;;  %v792_v7 = vmul.f32 0.2, %v760_v62  ;;  %914 = vrsqrt.f32 %v1477_v63 }
 0x34e   :  { %822 = vst.msk [vmem:[%s1592_s3 + $0x8] sm:$0xff] %vm98_vm2, %v806_v41  ;;  %v716_v10 = vsel %vm715_vm7, %v1428_v32, %v712_v9  ;;  %916 = vrsqrt.f32 %v1479_v2  ;;  %v639_v11 = vmul.f32 %v911_v3, %v638_v5  ;;  %v1498_v23 = vadd.f32 1e-05, %v579_v13 }
 0x34f   :  { %v808_v54 = vsel %vm776_vm6, %v760_v62, %v792_v7  ;;  %v768_v12 = vmul.f32 %v716_v10, %v1283_v4  ;;  %vm644_vm9 = vweird.f32 %v911_v3  ;;  %vm723_vm12 = vweird.f32 %v1464_v60 }
 0x350   :  { %824 = vst.msk [vmem:[%s1592_s3 + $0x18] sm:$0xff] %vm98_vm2, %v808_v54  ;;  %v913_v19 = vpop.eup %912  ;;  %v640_v21 = vmul.f32 0.5, %v639_v11  ;;  %918 = vrsqrt.f32 %v1498_v23  ;;  %vm645_vm11 = vmor %vm643_vm10, %vm644_vm9  ;;  %vm653_vm14 = vweird.f32 %v1477_v63  ;;  %vm663_vm3 = vweird.f32 %v1479_v2 }
 0x351   :  { %v540_v18 = vpop.xlane.xlu0 %539  ;;  %vm784_vm8 = vcmp.ge.f32.partialorder %v768_v12, 0.0  ;;  %v800_v8 = vmul.f32 0.2, %v768_v12  ;;  %v718_v31 = vmul.f32 %v913_v19, %v1464_v60  ;;  %vm724_vm13 = vweird.f32 %v913_v19 }
 0x352   :  { %v564_v24 = vpop.xlane.xlu2 %563  ;;  %v572_v20 = vmul.f32 %v540_v18, %v987_v28  ;;  %v641_v4 = vsub.f32 1.5, %v640_v21  ;;  %vm725_vm1 = vmor %vm723_vm12, %vm724_vm13 }
 0x353   :  { %v580_v29 = vmul.f32 %v564_v24, %v987_v28  ;;  %v915_v32 = vpop.eup %914  ;;  %v816_v48 = vsel %vm784_vm8, %v768_v12, %v800_v8  ;;  %v719_v35 = vmul.f32 %v913_v19, %v718_v31 }
 0x354   :  { %v917_v33 = vpop.eup %916  ;;  %832 = vst.msk [vmem:[%s1592_s3 + $0x58] sm:$0xff] %vm98_vm2, %v816_v48  ;;  %v648_v36 = vmul.f32 %v915_v32, %v1477_v63  ;;  %v1509_v49 = vadd.f32 1e-05, %v572_v20  ;;  %v642_v56 = vmul.f32 %v911_v3, %v641_v4  ;;  %vm654_vm15 = vweird.f32 %v915_v32 }
 0x355   :  { %v658_v40 = vmul.f32 %v917_v33, %v1479_v2  ;;  %v1513_v44 = vadd.f32 1e-05, %v580_v29  ;;  %v720_v25 = vmul.f32 0.5, %v719_v35  ;;  %vm664_vm4 = vweird.f32 %v917_v33  ;;  %vm655_vm5 = vmor %vm653_vm14, %vm654_vm15 }
 0x356   :  { %v649_v43 = vmul.f32 %v915_v32, %v648_v36  ;;  %920 = vrsqrt.f32 %v1509_v49  ;;  %v646_v26 = vsel %vm645_vm11, %v911_v3, %v642_v56  ;;  %v1519_v52 = vpop.eup %918  ;;  %vm665_vm6 = vmor %vm663_vm3, %vm664_vm4  ;;  %vm743_vm11 = vweird.f32 %v1498_v23 }
 0x357   :  { %v659_v16 = vmul.f32 %v917_v33, %v658_v40  ;;  %922 = vrsqrt.f32 %v1513_v44  ;;  %v761_v53 = vmul.f32 %v646_v26, %v1299_v15  ;;  %v721_v46 = vsub.f32 1.5, %v720_v25 }
 0x358   :  { %v650_v14 = vmul.f32 0.5, %v649_v43  ;;  %v738_v0 = vmul.f32 %v1519_v52, %v1498_v23  ;;  %vm744_vm7 = vweird.f32 %v1519_v52  ;;  %vm673_vm15 = vweird.f32 %v1509_v49 }
 0x359   :  { %v558_v51 = vpop.xlane.xlu0 %557  ;;  %v660_v57 = vmul.f32 0.5, %v659_v16  ;;  %vm777_vm0 = vcmp.ge.f32.partialorder %v761_v53, 0.0  ;;  %v793_v30 = vmul.f32 0.2, %v761_v53  ;;  %v722_v45 = vmul.f32 %v913_v19, %v721_v46  ;;  %vm745_vm13 = vmor %vm743_vm11, %vm744_vm7 }
 0x35a   :  { %v578_v58 = vmul.f32 %v558_v51, %v987_v28  ;;  %v651_v34 = vsub.f32 1.5, %v650_v14  ;;  %v739_v39 = vmul.f32 %v1519_v52, %v738_v0 }
 0x35b   :  { %v661_v15 = vsub.f32 1.5, %v660_v57  ;;  %v809_v42 = vsel %vm777_vm0, %v761_v53, %v793_v30  ;;  %v726_v61 = vsel %vm725_vm1, %v913_v19, %v722_v45  ;;  %vm753_vm1 = vweird.f32 %v1513_v44 }
 0x35c   :  { %v921_v59 = vpop.eup %920  ;;  %v652_v1 = vmul.f32 %v915_v32, %v651_v34  ;;  %v1528_v22 = vadd.f32 1e-05, %v578_v58  ;;  %825 = vst.msk [vmem:[%s1592_s3 + $0x20] sm:$0xff] %vm98_vm2, %v809_v42  ;;  %v769_v60 = vmul.f32 %v726_v61, %v1303_v17  ;;  %v740_v5 = vmul.f32 0.5, %v739_v39 }
 0x35d   :  { %v923_v28 = vpop.eup %922  ;;  %v662_v62 = vmul.f32 %v917_v33, %v661_v15  ;;  %v668_v3 = vmul.f32 %v921_v59, %v1509_v49  ;;  %vm674_vm12 = vweird.f32 %v921_v59 }
 0x35e   :  { %v656_v41 = vsel %vm655_vm5, %v915_v32, %v652_v1  ;;  %v748_v7 = vmul.f32 %v923_v28, %v1513_v44  ;;  %vm785_vm8 = vcmp.ge.f32.partialorder %v769_v60, 0.0  ;;  %v801_v17 = vmul.f32 0.2, %v769_v60  ;;  %vm675_vm0 = vmor %vm673_vm15, %vm674_vm12 }
 0x35f   :  { %v762_v9 = vmul.f32 %v656_v41, %v1313_v27  ;;  %v666_v63 = vsel %vm665_vm6, %v917_v33, %v662_v62  ;;  %v669_v54 = vmul.f32 %v921_v59, %v668_v3  ;;  %924 = vrsqrt.f32 %v1528_v22 }
 0x360   :  { %v763_v6 = vmul.f32 %v666_v63, %v1321_v37  ;;  %v749_v10 = vmul.f32 %v923_v28, %v748_v7  ;;  %v817_v12 = vsel %vm785_vm8, %v769_v60, %v801_v17  ;;  %v741_v13 = vsub.f32 1.5, %v740_v5 }
 0x361   :  { %vm778_vm9 = vcmp.ge.f32.partialorder %v762_v9, 0.0  ;;  %v794_v11 = vmul.f32 0.2, %v762_v9  ;;  %833 = vst.msk [vmem:[%s1592_s3 + $0x60] sm:$0xff] %vm98_vm2, %v817_v12  ;;  %v670_v27 = vmul.f32 0.5, %v669_v54  ;;  %vm754_vm14 = vweird.f32 %v923_v28 }
 0x362   :  { %vm779_vm10 = vcmp.ge.f32.partialorder %v763_v6, 0.0  ;;  %v795_v2 = vmul.f32 0.2, %v763_v6  ;;  %v750_v37 = vmul.f32 0.5, %v749_v10  ;;  %v742_v8 = vmul.f32 %v1519_v52, %v741_v13  ;;  %vm755_vm3 = vmor %vm753_vm1, %vm754_vm14 }
 0x363   :  { %v810_v18 = vsel %vm778_vm9, %v762_v9, %v794_v11  ;;  %v671_v21 = vsub.f32 1.5, %v670_v27  ;;  %vm733_vm8 = vweird.f32 %v1528_v22 }
 0x364   :  { %826 = vst.msk [vmem:[%s1592_s3 + $0x28] sm:$0xff] %vm98_vm2, %v810_v18  ;;  %v811_v19 = vsel %vm779_vm10, %v763_v6, %v795_v2  ;;  %v751_v23 = vsub.f32 1.5, %v750_v37  ;;  %v746_v24 = vsel %vm745_vm13, %v1519_v52, %v742_v8 }
 0x365   :  { %827 = vst.msk [vmem:[%s1592_s3 + $0x30] sm:$0xff] %vm98_vm2, %v811_v19  ;;  %v672_v31 = vmul.f32 %v921_v59, %v671_v21  ;;  %v925_v20 = vpop.eup %924  ;;  %v771_v29 = vmul.f32 %v746_v24, %v1324_v38 }
 0x366   :  { %v752_v32 = vmul.f32 %v923_v28, %v751_v23  ;;  %v728_v4 = vmul.f32 %v925_v20, %v1528_v22  ;;  %vm734_vm7 = vweird.f32 %v925_v20 }
 0x367   :  { %v676_v48 = vsel %vm675_vm0, %v921_v59, %v672_v31  ;;  %vm787_vm4 = vcmp.ge.f32.partialorder %v771_v29, 0.0  ;;  %v803_v33 = vmul.f32 0.2, %v771_v29  ;;  %vm735_vm9 = vmor %vm733_vm8, %vm734_vm7 }
 0x368   :  { %v764_v35 = vmul.f32 %v676_v48, %v1336_v47  ;;  %v756_v36 = vsel %vm755_vm3, %v923_v28, %v752_v32  ;;  %v729_v40 = vmul.f32 %v925_v20, %v728_v4 }
 0x369   :  { %v772_v56 = vmul.f32 %v756_v36, %v1339_v50  ;;  %v819_v49 = vsel %vm787_vm4, %v771_v29, %v803_v33 }
 0x36a   :  { %vm780_vm5 = vcmp.ge.f32.partialorder %v764_v35, 0.0  ;;  %v796_v25 = vmul.f32 0.2, %v764_v35  ;;  %835 = vst.msk [vmem:[%s1592_s3 + $0x70] sm:$0xff] %vm98_vm2, %v819_v49  ;;  %v730_v44 = vmul.f32 0.5, %v729_v40 }
 0x36b   :  { %vm788_vm6 = vcmp.ge.f32.partialorder %v772_v56, 0.0  ;;  %v804_v38 = vmul.f32 0.2, %v772_v56 }
 0x36c   :  { %v812_v43 = vsel %vm780_vm5, %v764_v35, %v796_v25  ;;  %v731_v50 = vsub.f32 1.5, %v730_v44 }
 0x36d   :  { %828 = vst.msk [vmem:[%s1592_s3 + $0x38] sm:$0xff] %vm98_vm2, %v812_v43  ;;  %v820_v47 = vsel %vm788_vm6, %v772_v56, %v804_v38 }
 0x36e   :  { %836 = vst.msk [vmem:[%s1592_s3 + $0x78] sm:$0xff] %vm98_vm2, %v820_v47  ;;  %v732_v26 = vmul.f32 %v925_v20, %v731_v50 }
 0x370   :  { %v736_v16 = vsel %vm735_vm9, %v925_v20, %v732_v26 }
 0x371   :  { %v770_v53 = vmul.f32 %v736_v16, %v1346_v55 }
 0x373   :  { %vm786_vm10 = vcmp.ge.f32.partialorder %v770_v53, 0.0  ;;  %v802_v46 = vmul.f32 0.2, %v770_v53 }
 0x375   :  { %v818_v14 = vsel %vm786_vm10, %v770_v53, %v802_v46 }
 0x376   :  { %834 = vst.msk [vmem:[%s1592_s3 + $0x68] sm:$0xff] %vm98_vm2, %v818_v14 }

</bundles_post_ra>
